<compile_context>
chip_gen: v7x
topology: tpu7x:2x2x1
jax: 0.10.0
libtpu: 0.0.40
codegen_flags: <defaults>
</compile_context>

<pallas_src>
import functools

import jax
import jax.numpy as jnp
from jax.experimental import pallas as pl
from jax.experimental.pallas import tpu as pltpu

LN_EPS = 1e-5


def _ff_kernel(x_ref, g_ref, b_ref, wa_ref, wg_ref, wd_ref, o_ref,
               xn_ref, acc_ref):
    # x_ref:  (TM, dim)        token tile
    # g_ref:  (1, dim)         LayerNorm weight
    # b_ref:  (1, dim)         LayerNorm bias
    # wa_ref: (TH, dim)        up-proj, "a" half      (torch (out, in) layout)
    # wg_ref: (TH, dim)        up-proj, "gate" half   (torch (out, in) layout)
    # wd_ref: (dim, TH)        down-proj              (torch (out, in) layout)
    # o_ref:  (TM, dim)        output tile
    # xn_ref: (TM, dim)        cached LayerNorm output (matmul input dtype)
    # acc_ref:(TM, dim) f32    down-proj accumulator across hidden chunks
    h_idx = pl.program_id(1)
    n_h = pl.num_programs(1)

    @pl.when(h_idx == 0)
    def _():
        # LayerNorm once per token tile (biased variance, like nn.LayerNorm).
        # gamma/beta cast + broadcast hoisted here, not per hidden chunk.
        x = x_ref[...].astype(jnp.float32)
        mean = jnp.mean(x, axis=-1, keepdims=True)
        xc = x - mean
        var = jnp.mean(xc * xc, axis=-1, keepdims=True)
        xn = xc * jax.lax.rsqrt(var + LN_EPS)
        xn = xn * g_ref[...].astype(jnp.float32) + b_ref[...].astype(jnp.float32)
        xn_ref[...] = xn.astype(xn_ref.dtype)
        acc_ref[...] = jnp.zeros_like(acc_ref)

    # Contract on the weight's last (input) dim: x @ W.T with no wrapper-side
    # transpose/copy of the weights.
    dn = (((1,), (1,)), ((), ()))
    xn = xn_ref[...]

    a = jax.lax.dot_general(xn, wa_ref[...], dn,
                            preferred_element_type=jnp.float32)
    gate = jax.lax.dot_general(xn, wg_ref[...], dn,
                               preferred_element_type=jnp.float32)
    # SwiGLU on this hidden chunk (f32 VPU math, sigmoid on the EUP).
    act = a * (gate * jax.nn.sigmoid(gate))

    acc_ref[...] += jax.lax.dot_general(act.astype(wd_ref.dtype), wd_ref[...],
                                        dn, preferred_element_type=jnp.float32)

    @pl.when(h_idx == n_h - 1)
    def _():
        o_ref[...] = acc_ref[...].astype(o_ref.dtype)


def _largest_divisor_at_most(n, cap):
    cap = max(1, min(cap, n))
    for d in range(cap, 0, -1):
        if n % d == 0:
            return d
    return 1


@functools.partial(jax.jit, static_argnames=("tile_m", "tile_h"))
def feed_forward(x, ln_weight, ln_bias, w_up, w_down, *, tile_m=256, tile_h=512):
    """x: (B, T, dim). w_up: (2*hidden, dim) torch layout. w_down: (dim, hidden).

    tile_m: requested token-tile rows (128 on v5e, 256 on v6e/v7x); clamped to
            the largest divisor of the token count.
    tile_h: requested hidden-chunk width (multiple of 128 at real sizes; shrink
            on v7x if the weight chunks + double buffering approach its 64 MiB
            VMEM); clamped to the largest divisor of hidden_dim.
    """
    B, T, dim = x.shape
    two_hidden = w_up.shape[0]
    hidden = two_hidden // 2

    N = B * T
    tile_m = _largest_divisor_at_most(N, tile_m)
    tile_h = _largest_divisor_at_most(hidden, tile_h)

    x2d = x.reshape(N, dim)
    # Split the fused up-projection into the two SwiGLU halves along the
    # leading (output) dim — a contiguous slice, no transpose/copy of weights.
    w_a = w_up[:hidden]        # (hidden, dim)  "a" half
    w_gate = w_up[hidden:]     # (hidden, dim)  "gate" half
    gamma = ln_weight.reshape(1, dim)
    beta = ln_bias.reshape(1, dim)

    grid = (N // tile_m, hidden // tile_h)

    bytes_accessed = (x2d.size * x2d.dtype.itemsize
                      + w_up.size * w_up.dtype.itemsize
                      + w_down.size * w_down.dtype.itemsize
                      + gamma.size * gamma.dtype.itemsize
                      + beta.size * beta.dtype.itemsize
                      + N * dim * x.dtype.itemsize)
    cost = pl.CostEstimate(
        flops=6 * N * dim * hidden,          # a + gate + down matmuls
        transcendentals=N * hidden,          # sigmoid
        bytes_accessed=bytes_accessed,
    )

    out2d = pl.pallas_call(
        _ff_kernel,
        out_shape=jax.ShapeDtypeStruct((N, dim), x.dtype),
        grid_spec=pltpu.PrefetchScalarGridSpec(
            num_scalar_prefetch=0,
            grid=grid,
            in_specs=[
                pl.BlockSpec((tile_m, dim), lambda i, h: (i, 0)),
                pl.BlockSpec((1, dim), lambda i, h: (0, 0)),
                pl.BlockSpec((1, dim), lambda i, h: (0, 0)),
                pl.BlockSpec((tile_h, dim), lambda i, h: (h, 0)),
                pl.BlockSpec((tile_h, dim), lambda i, h: (h, 0)),
                pl.BlockSpec((dim, tile_h), lambda i, h: (0, h)),
            ],
            out_specs=pl.BlockSpec((tile_m, dim), lambda i, h: (i, 0)),
            scratch_shapes=[
                pltpu.VMEM((tile_m, dim), w_up.dtype),   # cached LN output
                pltpu.VMEM((tile_m, dim), jnp.float32),  # down-proj accumulator
            ],
        ),
        compiler_params=pltpu.CompilerParams(
            # token axis is independent (megacore sharding), hidden axis is the
            # accumulator reduction -> arbitrary, last.
            dimension_semantics=("parallel", "arbitrary"),
            vmem_limit_bytes=64 * 1024 * 1024,
        ),
        cost_estimate=cost,
    )(x2d, gamma, beta, w_a, w_gate, w_down)

    return out2d.reshape(B, T, dim)


def feed_forward_ref(x, ln_weight, ln_bias, w_up, w_down):
    """Pure-JAX reference matching the PyTorch module."""
    xf = x.astype(jnp.float32)
    mean = jnp.mean(xf, axis=-1, keepdims=True)
    var = jnp.mean((xf - mean) ** 2, axis=-1, keepdims=True)
    xn = (xf - mean) * jax.lax.rsqrt(var + LN_EPS) * ln_weight + ln_bias
    h = xn @ w_up.T.astype(jnp.float32)
    hidden = w_up.shape[0] // 2
    a, gate = h[..., :hidden], h[..., hidden:]
    act = a * (gate * jax.nn.sigmoid(gate))
    return (act @ w_down.T.astype(jnp.float32)).astype(x.dtype)


if __name__ == "__main__":
    # Small shapes: batch=2, seq=8, dim=32, hidden_dim=64
    B, T, dim, hidden = 2, 8, 32, 64

    key = jax.random.PRNGKey(0)
    kx, ku, kd = jax.random.split(key, 3)

    x = jax.random.normal(kx, (B, T, dim), dtype=jnp.float32)

    # LayerNorm params: PyTorch default init (weight=1, bias=0)
    ln_weight = jnp.ones((dim,), dtype=jnp.float32)
    ln_bias = jnp.zeros((dim,), dtype=jnp.float32)

    # up: nn.Linear(dim, 2*hidden, bias=False) default init range
    bound_up = 1.0 / (dim ** 0.5)
    w_up = jax.random.uniform(ku, (2 * hidden, dim), minval=-bound_up,
                              maxval=bound_up, dtype=jnp.float32)

    # down: the module zero-inits this (zero_init). Use deterministic random
    # weights here so the kernel's hot path is actually exercised by the check.
    # TODO(synk): set w_down = jnp.zeros((dim, hidden)) to match zero_init exactly.
    bound_dn = 1.0 / (hidden ** 0.5)
    w_down = jax.random.uniform(kd, (dim, hidden), minval=-bound_dn,
                                maxval=bound_dn, dtype=jnp.float32)

    out = feed_forward(x, ln_weight, ln_bias, w_up, w_down)
    out = jax.block_until_ready(out)

    ref = feed_forward_ref(x, ln_weight, ln_bias, w_up, w_down)
    assert out.shape == (B, T, dim)
    assert jnp.allclose(out, ref, atol=1e-5, rtol=1e-5), (
        f"max abs err = {jnp.max(jnp.abs(out - ref))}")

    print("KERNEL_OK")
</pallas_src>

<mosaic_0001>
module attributes {stable_mosaic.version = 11 : i64} {
  func.func @_ff_kernel(%arg0: i32, %arg1: i32, %arg2: memref<16x32xf32, #tpu.memory_space<vmem>>, %arg3: memref<1x32xf32, #tpu.memory_space<vmem>>, %arg4: memref<1x32xf32, #tpu.memory_space<vmem>>, %arg5: memref<64x32xf32, #tpu.memory_space<vmem>>, %arg6: memref<64x32xf32, #tpu.memory_space<vmem>>, %arg7: memref<32x64xf32, #tpu.memory_space<vmem>>, %arg8: memref<16x32xf32, #tpu.memory_space<vmem>>, %arg9: memref<16x32xf32, #tpu.memory_space<vmem>>, %arg10: memref<16x32xf32, #tpu.memory_space<vmem>>) attributes {dimension_semantics = [#tpu.dimension_semantics<parallel>, #tpu.dimension_semantics<arbitrary>], iteration_bounds = array<i64: 1, 1>, scalar_prefetch = 0 : i64, scratch_operands = 2 : i64, tpu.core_type = #tpu.core_type<tc>, window_params = [{transform_indices = @transform_0, window_bounds = array<i64: 16, 32>}, {pipeline_mode = #tpu.pipeline_mode<synchronous>, transform_indices = @transform_1, window_bounds = array<i64: 1, 32>}, {pipeline_mode = #tpu.pipeline_mode<synchronous>, transform_indices = @transform_2, window_bounds = array<i64: 1, 32>}, {transform_indices = @transform_3, window_bounds = array<i64: 64, 32>}, {transform_indices = @transform_4, window_bounds = array<i64: 64, 32>}, {transform_indices = @transform_5, window_bounds = array<i64: 32, 64>}, {transform_indices = @transform_6, window_bounds = array<i64: 16, 32>}]} {
    %c0_i32 = arith.constant 0 : i32
    %0 = arith.cmpi eq, %arg1, %c0_i32 : i32
    %1 = arith.extui %0 : i1 to i32
    %c0_i32_0 = arith.constant 0 : i32
    %2 = arith.cmpi ne, %1, %c0_i32_0 : i32
    scf.if %2 {
      %c0_17 = arith.constant 0 : index
      %c0_18 = arith.constant 0 : index
      %23 = vector.load %arg2[%c0_17, %c0_18] : memref<16x32xf32, #tpu.memory_space<vmem>>, vector<16x32xf32>
      %cst_19 = arith.constant dense<0.000000e+00> : vector<16xf32>
      %24 = vector.multi_reduction <add>, %23, %cst_19 [1] : vector<16x32xf32> to vector<16xf32>
      %25 = vector.shape_cast %24 : vector<16xf32> to vector<16x1xf32>
      %cst_20 = arith.constant 3.200000e+01 : f32
      %26 = vector.broadcast %cst_20 : f32 to vector<16x1xf32>
      %27 = arith.divf %25, %26 : vector<16x1xf32>
      %28 = vector.broadcast %27 : vector<16x1xf32> to vector<16x32xf32>
      %29 = arith.subf %23, %28 : vector<16x32xf32>
      %30 = arith.mulf %29, %29 : vector<16x32xf32>
      %cst_21 = arith.constant dense<0.000000e+00> : vector<16xf32>
      %31 = vector.multi_reduction <add>, %30, %cst_21 [1] : vector<16x32xf32> to vector<16xf32>
      %32 = vector.shape_cast %31 : vector<16xf32> to vector<16x1xf32>
      %cst_22 = arith.constant 3.200000e+01 : f32
      %33 = vector.broadcast %cst_22 : f32 to vector<16x1xf32>
      %34 = arith.divf %32, %33 : vector<16x1xf32>
      %cst_23 = arith.constant 9.99999974E-6 : f32
      %35 = vector.broadcast %cst_23 : f32 to vector<16x1xf32>
      %36 = arith.addf %34, %35 : vector<16x1xf32>
      %37 = math.rsqrt %36 : vector<16x1xf32>
      %38 = vector.broadcast %37 : vector<16x1xf32> to vector<16x32xf32>
      %39 = arith.mulf %29, %38 : vector<16x32xf32>
      %c0_24 = arith.constant 0 : index
      %c0_25 = arith.constant 0 : index
      %40 = vector.load %arg3[%c0_24, %c0_25] : memref<1x32xf32, #tpu.memory_space<vmem>>, vector<1x32xf32>
      %41 = vector.broadcast %40 : vector<1x32xf32> to vector<16x32xf32>
      %42 = arith.mulf %39, %41 : vector<16x32xf32>
      %c0_26 = arith.constant 0 : index
      %c0_27 = arith.constant 0 : index
      %43 = vector.load %arg4[%c0_26, %c0_27] : memref<1x32xf32, #tpu.memory_space<vmem>>, vector<1x32xf32>
      %44 = vector.broadcast %43 : vector<1x32xf32> to vector<16x32xf32>
      %45 = arith.addf %42, %44 : vector<16x32xf32>
      %c0_28 = arith.constant 0 : index
      %c0_29 = arith.constant 0 : index
      %46 = vector.load %arg9[%c0_28, %c0_29] : memref<16x32xf32, #tpu.memory_space<vmem>>, vector<16x32xf32>
      tpu.vector_store %arg9[%c0_28, %c0_29], %45 {strides = array<i32>} : memref<16x32xf32, #tpu.memory_space<vmem>>, vector<16x32xf32>,
      %cst_30 = arith.constant 0.000000e+00 : f32
      %47 = vector.broadcast %cst_30 : f32 to vector<16x32xf32>
      %c0_31 = arith.constant 0 : index
      %c0_32 = arith.constant 0 : index
      %48 = vector.load %arg10[%c0_31, %c0_32] : memref<16x32xf32, #tpu.memory_space<vmem>>, vector<16x32xf32>
      tpu.vector_store %arg10[%c0_31, %c0_32], %47 {strides = array<i32>} : memref<16x32xf32, #tpu.memory_space<vmem>>, vector<16x32xf32>,
    } else {
    }
    %c0 = arith.constant 0 : index
    %c0_1 = arith.constant 0 : index
    %3 = vector.load %arg9[%c0, %c0_1] : memref<16x32xf32, #tpu.memory_space<vmem>>, vector<16x32xf32>
    %c0_2 = arith.constant 0 : index
    %c0_3 = arith.constant 0 : index
    %4 = vector.load %arg5[%c0_2, %c0_3] : memref<64x32xf32, #tpu.memory_space<vmem>>, vector<64x32xf32>
    %cst = arith.constant dense<0.000000e+00> : vector<16x64xf32>
    %5 = tpu.matmul %3, %4, %cst {dimension_numbers = #tpu.dot_dimension_numbers<[1], [1], [0], [0], [0, 0, 1, 0], [], []>} : vector<16x32xf32>, vector<64x32xf32>, vector<16x64xf32> -> vector<16x64xf32>
    %c0_4 = arith.constant 0 : index
    %c0_5 = arith.constant 0 : index
    %6 = vector.load %arg6[%c0_4, %c0_5] : memref<64x32xf32, #tpu.memory_space<vmem>>, vector<64x32xf32>
    %cst_6 = arith.constant dense<0.000000e+00> : vector<16x64xf32>
    %7 = tpu.matmul %3, %6, %cst_6 {dimension_numbers = #tpu.dot_dimension_numbers<[1], [1], [0], [0], [0, 0, 1, 0], [], []>} : vector<16x32xf32>, vector<64x32xf32>, vector<16x64xf32> -> vector<16x64xf32>
    %8 = arith.negf %7 : vector<16x64xf32>
    %9 = math.exp %8 : vector<16x64xf32>
    %cst_7 = arith.constant 1.000000e+00 : f32
    %10 = vector.broadcast %cst_7 : f32 to vector<16x64xf32>
    %11 = arith.addf %10, %9 : vector<16x64xf32>
    %12 = arith.divf %10, %11 : vector<16x64xf32>
    %13 = arith.mulf %7, %12 : vector<16x64xf32>
    %14 = arith.mulf %5, %13 : vector<16x64xf32>
    %c0_8 = arith.constant 0 : index
    %c0_9 = arith.constant 0 : index
    %15 = vector.load %arg10[%c0_8, %c0_9] : memref<16x32xf32, #tpu.memory_space<vmem>>, vector<16x32xf32>
    %c0_10 = arith.constant 0 : index
    %c0_11 = arith.constant 0 : index
    %16 = vector.load %arg7[%c0_10, %c0_11] : memref<32x64xf32, #tpu.memory_space<vmem>>, vector<32x64xf32>
    %cst_12 = arith.constant dense<0.000000e+00> : vector<16x32xf32>
    %17 = tpu.matmul %14, %16, %cst_12 {dimension_numbers = #tpu.dot_dimension_numbers<[1], [1], [0], [0], [0, 0, 1, 0], [], []>} : vector<16x64xf32>, vector<32x64xf32>, vector<16x32xf32> -> vector<16x32xf32>
    %18 = arith.addf %15, %17 : vector<16x32xf32>
    %c0_13 = arith.constant 0 : index
    %c0_14 = arith.constant 0 : index
    %19 = vector.load %arg10[%c0_13, %c0_14] : memref<16x32xf32, #tpu.memory_space<vmem>>, vector<16x32xf32>
    tpu.vector_store %arg10[%c0_13, %c0_14], %18 {strides = array<i32>} : memref<16x32xf32, #tpu.memory_space<vmem>>, vector<16x32xf32>,
    %c0_i32_15 = arith.constant 0 : i32
    %20 = arith.cmpi eq, %arg1, %c0_i32_15 : i32
    %21 = arith.extui %20 : i1 to i32
    %c0_i32_16 = arith.constant 0 : i32
    %22 = arith.cmpi ne, %21, %c0_i32_16 : i32
    scf.if %22 {
      %c0_17 = arith.constant 0 : index
      %c0_18 = arith.constant 0 : index
      %23 = vector.load %arg10[%c0_17, %c0_18] : memref<16x32xf32, #tpu.memory_space<vmem>>, vector<16x32xf32>
      %c0_19 = arith.constant 0 : index
      %c0_20 = arith.constant 0 : index
      %24 = vector.load %arg8[%c0_19, %c0_20] : memref<16x32xf32, #tpu.memory_space<vmem>>, vector<16x32xf32>
      tpu.vector_store %arg8[%c0_19, %c0_20], %23 {strides = array<i32>} : memref<16x32xf32, #tpu.memory_space<vmem>>, vector<16x32xf32>,
    } else {
    }
    return
  }
  func.func @transform_0(%arg0: i32, %arg1: i32) -> (i32, i32) {
    %c0_i32 = arith.constant 0 : i32
    %c0_i32_0 = arith.constant 0 : i32
    return %arg0, %c0_i32 : i32, i32
  }
  func.func @transform_1(%arg0: i32, %arg1: i32) -> (i32, i32) {
    %c0_i32 = arith.constant 0 : i32
    %c0_i32_0 = arith.constant 0 : i32
    %c0_i32_1 = arith.constant 0 : i32
    return %c0_i32, %c0_i32_0 : i32, i32
  }
  func.func @transform_2(%arg0: i32, %arg1: i32) -> (i32, i32) {
    %c0_i32 = arith.constant 0 : i32
    %c0_i32_0 = arith.constant 0 : i32
    %c0_i32_1 = arith.constant 0 : i32
    return %c0_i32, %c0_i32_0 : i32, i32
  }
  func.func @transform_3(%arg0: i32, %arg1: i32) -> (i32, i32) {
    %c0_i32 = arith.constant 0 : i32
    %c0_i32_0 = arith.constant 0 : i32
    return %arg1, %c0_i32 : i32, i32
  }
  func.func @transform_4(%arg0: i32, %arg1: i32) -> (i32, i32) {
    %c0_i32 = arith.constant 0 : i32
    %c0_i32_0 = arith.constant 0 : i32
    return %arg1, %c0_i32 : i32, i32
  }
  func.func @transform_5(%arg0: i32, %arg1: i32) -> (i32, i32) {
    %c0_i32 = arith.constant 0 : i32
    %c0_i32_0 = arith.constant 0 : i32
    return %c0_i32, %arg1 : i32, i32
  }
  func.func @transform_6(%arg0: i32, %arg1: i32) -> (i32, i32) {
    %c0_i32 = arith.constant 0 : i32
    %c0_i32_0 = arith.constant 0 : i32
    return %arg0, %c0_i32 : i32, i32
  }
}

</mosaic_0001>

<bundles_post_ra>
// kernel: feed_forward.1
= control target key start
LH: loop header
LB: loop body
LE: loop exit
PB: predicated region body
PF: predicated region fallthrough
CT: control target
= control target key end

     0   :  { %11 = vsyncpa [#allocation5], 0  ;;  %s1081_s0 = inlined_call_operand.hbm [shape: f32[16,32], index: 0, kind: input, shape index: {}]   ;;  %s1082_s1 = inlined_call_operand.hbm [shape: f32[1,32], index: 1, kind: input, shape index: {}]   ;;  %s1083_s2 = inlined_call_operand.hbm [shape: f32[1,32], index: 2, kind: input, shape index: {}]   ;;  %s1084_s3 = inlined_call_operand.hbm [shape: f32[64,32], index: 3, kind: input, shape index: {}]   ;;  %s1085_s4 = inlined_call_operand.hbm [shape: f32[64,32], index: 4, kind: input, shape index: {}]   ;;  %s1086_s5 = inlined_call_operand.hbm [shape: f32[32,64], index: 5, kind: input, shape index: {}]   ;;  %s1087_s6 = inlined_call_operand.hbm [shape: f32[16,32], index: 6, kind: output, shape index: {}]  }
   0x1   :  { %12 = vsyncpa [#allocation8], 0 }
   0x2   :  { %13 = vsyncpa [#allocation11], 0 }
   0x3   :  { %14 = vsyncpa [#allocation14], 0 }
   0x4   :  { %15 = vsyncpa [#allocation6], 0  ;;  %s879_s21 = smov [#allocation7]   ;;  %s715_s25 = scalar_lea.hbm %s1082_s1, 16 }
   0x5   :  { %s34_s22 = sshll.u32 %s879_s21, 4  ;;  %p716_p0 = scmp.ne.s32.totalorder %s1082_s1, %s715_s25  ;;  %s35_s22 = int_to_ptr.vmem [resolvable:$true] %s34_s22 }
   0x6   :  { %p719_p1 = scmp.lt.u32.totalorder %s715_s25, %s1082_s1 }
   0x8   :  { %p721_p2 = pnand %p719_p1, %p716_p0 }
   0xa   :  { %724 = shalt.err (!%p721_p2)
}
   0xb   :  { %s725_s30 = scalar_lea.vmem %s35_s22, 16  ;;  %s729_s7 = scalar_lea.vmem %s35_s22, 32 }
   0xc   :  { %p726_p3 = scmp.ne.s32.totalorder %s35_s22, %s725_s30  ;;  %p730_p4 = scmp.lt.s32.totalorder %s35_s22, %s35_s22 }
   0xd   :  { %p731_p5 = scmp.lt.s32.totalorder %s729_s7, %s725_s30 }
   0xf   :  { %p732_p6 = por %p731_p5, %p730_p4 }
  0x11   :  { %p733_p7 = pnand %p732_p6, %p726_p3 }
  0x13   :  { %736 = shalt.err (!%p733_p7)
}
  0x14   :  { %37 = dma.hbm_to_vmem [thread:$0]  %s1082_s1, 16, %s35_s22, [#allocation8]  }
  0x15   :  { %s880_s10 = smov [#allocation10]   ;;  %s881_s12 = smov [#allocation4]  }
  0x16   :  { %s53_s11 = sshll.u32 %s880_s10, 4  ;;  %s21_s13 = sshll.u32 %s881_s12, 4  ;;  %s54_s11 = int_to_ptr.vmem [resolvable:$true] %s53_s11  ;;  %s22_s13 = int_to_ptr.vmem [resolvable:$true] %s21_s13 }
  0x17   :  { %s737_s16 = scalar_lea.hbm %s1084_s3, 1024 }
  0x18   :  { %p738_p8 = scmp.ne.s32.totalorder %s1084_s3, %s737_s16  ;;  %p741_p9 = scmp.lt.u32.totalorder %s737_s16, %s1084_s3 }
  0x1a   :  { %p743_p10 = pnand %p741_p9, %p738_p8 }
  0x1c   :  { %746 = shalt.err (!%p743_p10)
}
  0x1d   :  { %s747_s1 = scalar_lea.vmem %s54_s11, 1024  ;;  %p752_p12 = scmp.lt.s32.totalorder %s54_s11, %s54_s11 }
  0x1e   :  { %p748_p11 = scmp.ne.s32.totalorder %s54_s11, %s747_s1  ;;  %p753_p13 = scmp.lt.s32.totalorder %s747_s1, %s747_s1 }
  0x20   :  { %p754_p0 = por %p753_p13, %p752_p12 }
  0x22   :  { %p755_p1 = pnand %p754_p0, %p748_p11 }
  0x24   :  { %758 = shalt.err (!%p755_p1)
}
  0x25   :  { %s882_s21 = smov 128   ;;  %s883_s22 = smov 8  }
  0x26   :  { %59 = dma.hbm_to_vmem [thread:$0]  %s1084_s3, 1024, %s54_s11, [#allocation11], %s882_s21, %s882_s21, %s883_s22  }
  0x27   :  { %s759_s27 = scalar_lea.hbm %s1081_s0, 256 }
  0x28   :  { %p760_p2 = scmp.ne.s32.totalorder %s1081_s0, %s759_s27  ;;  %p763_p3 = scmp.lt.u32.totalorder %s759_s27, %s1081_s0 }
  0x2a   :  { %p765_p4 = pnand %p763_p3, %p760_p2 }
  0x2c   :  { %768 = shalt.err (!%p765_p4)
}
  0x2d   :  { %s769_s8 = scalar_lea.vmem %s22_s13, 256  ;;  %p774_p6 = scmp.lt.s32.totalorder %s22_s13, %s22_s13 }
  0x2e   :  { %p770_p5 = scmp.ne.s32.totalorder %s22_s13, %s769_s8  ;;  %p775_p7 = scmp.lt.s32.totalorder %s769_s8, %s769_s8 }
  0x30   :  { %p776_p8 = por %p775_p7, %p774_p6 }
  0x32   :  { %p777_p9 = pnand %p776_p8, %p770_p5 }
  0x34   :  { %780 = shalt.err (!%p777_p9)
}
  0x35   :  { %27 = dma.hbm_to_vmem [thread:$0]  %s1081_s0, 256, %s22_s13, [#allocation5], %s882_s21, %s882_s21, %s883_s22  }
  0x36   :  { %s884_s10 = smov [#allocation9]   ;;  %s885_s12 = smov [#allocation12]  }
  0x37   :  { %s44_s11 = sshll.u32 %s884_s10, 4  ;;  %s65_s14 = sshll.u32 %s885_s12, 4  ;;  %s45_s11 = int_to_ptr.vmem [resolvable:$true] %s44_s11  ;;  %s66_s14 = int_to_ptr.vmem [resolvable:$true] %s65_s14 }
  0x38   :  { %s781_s17 = scalar_lea.hbm %s1083_s2, 16 }
  0x39   :  { %p782_p10 = scmp.ne.s32.totalorder %s1083_s2, %s781_s17  ;;  %p785_p11 = scmp.lt.u32.totalorder %s781_s17, %s1083_s2 }
  0x3b   :  { %p787_p12 = pnand %p785_p11, %p782_p10 }
  0x3d   :  { %790 = shalt.err (!%p787_p12)
}
  0x3e   :  { %s791_s0 = scalar_lea.vmem %s45_s11, 16  ;;  %s795_s13 = scalar_lea.vmem %s45_s11, 32 }
  0x3f   :  { %p792_p13 = scmp.ne.s32.totalorder %s45_s11, %s791_s0  ;;  %p796_p0 = scmp.lt.s32.totalorder %s45_s11, %s45_s11 }
  0x40   :  { %p797_p1 = scmp.lt.s32.totalorder %s795_s13, %s791_s0 }
  0x42   :  { %p798_p2 = por %p797_p1, %p796_p0 }
  0x44   :  { %p799_p3 = pnand %p798_p2, %p792_p13 }
  0x46   :  { %802 = shalt.err (!%p799_p3)
}
  0x47   :  { %47 = dma.hbm_to_vmem [thread:$0]  %s1083_s2, 16, %s45_s11, [#allocation8]  }
  0x48   :  { %s803_s27 = scalar_lea.hbm %s1085_s4, 1024 }
  0x49   :  { %p804_p4 = scmp.ne.s32.totalorder %s1085_s4, %s803_s27  ;;  %p807_p5 = scmp.lt.u32.totalorder %s803_s27, %s1085_s4 }
  0x4b   :  { %p809_p6 = pnand %p807_p5, %p804_p4 }
  0x4d   :  { %812 = shalt.err (!%p809_p6)
}
  0x4e   :  { %s813_s8 = scalar_lea.vmem %s66_s14, 1024  ;;  %p818_p8 = scmp.lt.s32.totalorder %s66_s14, %s66_s14 }
  0x4f   :  { %p814_p7 = scmp.ne.s32.totalorder %s66_s14, %s813_s8  ;;  %p819_p9 = scmp.lt.s32.totalorder %s813_s8, %s813_s8 }
  0x51   :  { %p820_p10 = por %p819_p9, %p818_p8 }
  0x53   :  { %p821_p11 = pnand %p820_p10, %p814_p7 }
  0x55   :  { %824 = shalt.err (!%p821_p11)
}
  0x56   :  { %71 = dma.hbm_to_vmem [thread:$0]  %s1085_s4, 1024, %s66_s14, [#allocation11], %s882_s21, %s882_s21, %s883_s22  }
  0x57   :  { %s886_s9 = smov [#allocation13]   ;;  %s825_s15 = scalar_lea.hbm %s1086_s5, 512 }
  0x58   :  { %s77_s10 = sshll.u32 %s886_s9, 4  ;;  %p826_p12 = scmp.ne.s32.totalorder %s1086_s5, %s825_s15  ;;  %s78_s10 = int_to_ptr.vmem [resolvable:$true] %s77_s10 }
  0x59   :  { %p829_p13 = scmp.lt.u32.totalorder %s825_s15, %s1086_s5 }
  0x5b   :  { %p831_p0 = pnand %p829_p13, %p826_p12 }
  0x5d   :  { %834 = shalt.err (!%p831_p0)
}
  0x5e   :  { %s835_s20 = scalar_lea.vmem %s78_s10, 512  ;;  %p840_p2 = scmp.lt.s32.totalorder %s78_s10, %s78_s10 }
  0x5f   :  { %p836_p1 = scmp.ne.s32.totalorder %s78_s10, %s835_s20  ;;  %p841_p3 = scmp.lt.s32.totalorder %s835_s20, %s835_s20 }
  0x61   :  { %p842_p4 = por %p841_p3, %p840_p2 }
  0x63   :  { %p843_p5 = pnand %p842_p4, %p836_p1 }
  0x65   :  { %846 = shalt.err (!%p843_p5)
}
  0x66   :  { %83 = dma.hbm_to_vmem [thread:$0]  %s1086_s5, 512, %s78_s10, [#allocation14], %s882_s21, %s882_s21, %s883_s22  }
  0x67   :  { %869 = dma.done.wait [#allocation5], 256  }
  0x68   :  { %870 = vsyncadd [#allocation5], 4294967040 }
  0x69   :  { %871 = dma.done.wait [#allocation8], 32  }
  0x6a   :  { %872 = vsyncadd [#allocation8], 4294967264 }
  0x6b   :  { %873 = dma.done.wait [#allocation11], 2048  }
  0x6c   :  { %874 = vsyncadd [#allocation11], 4294965248 }
  0x6d   :  { %875 = dma.done.wait [#allocation14], 512  }
  0x6e   :  { %876 = vsyncadd [#allocation14], 4294966784  ;;  %vm108_vm0 = vcmask 261120   ;;  %v106_v0 = vld [vmem:[#allocation4] sm:$0xff]  ;;  %v107_v1 = vld [vmem:[#allocation4 + $0x8] sm:$0xff]  ;;  %vm403_vm2 = vcmask 523264  }
  0x6f   :  { %v109_v2 = vsel %vm108_vm0, %v106_v0, 0.0  ;;  %v112_v3 = vsel %vm108_vm0, %v107_v1, 0.0  ;;  %v160_v14 = vld [vmem:[#allocation10] sm:$0xff]  ;;  %v161_v15 = vld [vmem:[#allocation10 + $0x8] sm:$0xff]  ;;  %vm1014_vm1 = vmpackc.low %vm108_vm0, %vm108_vm0  ;;  %v887_v63 = vmov 0.0   ;;  %s888_s5 = smov [#allocation15]  }
  0x70   :  { %110 = vadd.xlane.f32.xlu0 %v109_v2  ;;  %v274_v16 = vld [vmem:[#allocation12] sm:$0xff]  ;;  %v633_v17 = vpack.c.bf16 %v161_v15, %v160_v14  ;;  %v275_v18 = vld [vmem:[#allocation12 + $0x8] sm:$0xff]  ;;  %v162_v21 = vld [vmem:[#allocation10 + $0x10] sm:$0xff]  ;;  %157 = vst.msk [vmem:[#allocation3 + $0x8] sm:$0xff] %vm108_vm0, %v887_v63  ;;  %s513_s1 = sshll.u32 %s888_s5, 4  ;;  %s514_s1 = int_to_ptr.vmem [resolvable:$true] %s513_s1 }
  0x71   :  { %v657_v20 = vpack.c.bf16 %v275_v18, %v274_v16  ;;  %v163_v22 = vld [vmem:[#allocation10 + $0x18] sm:$0xff]  ;;  %v276_v23 = vld [vmem:[#allocation12 + $0x10] sm:$0xff]  ;;  %v164_v27 = vld [vmem:[#allocation10 + $0x20] sm:$0xff]  ;;  %156 = vst.msk [vmem:[#allocation3] sm:$0xff] %vm108_vm0, %v887_v63  ;;  %s847_s0 = scalar_lea.vmem %s514_s1, 256  ;;  %p852_p7 = scmp.lt.s32.totalorder %s514_s1, %s514_s1 }
  0x72   :  { %635 = vmatprep.subr.msk.bf16.mxu0 %vm1014_vm1, %v633_v17  ;;  %v639_v24 = vpack.c.bf16 %v163_v22, %v162_v21  ;;  %v277_v25 = vld [vmem:[#allocation12 + $0x18] sm:$0xff]  ;;  %v165_v28 = vld [vmem:[#allocation10 + $0x28] sm:$0xff]  ;;  %v278_v29 = vld [vmem:[#allocation12 + $0x20] sm:$0xff]  ;;  %p848_p6 = scmp.ne.s32.totalorder %s514_s1, %s847_s0  ;;  %p853_p8 = scmp.lt.s32.totalorder %s847_s0, %s847_s0 }
  0x73   :  { %659 = vmatprep.subr.msk.bf16.mxu1 %vm1014_vm1, %v657_v20  ;;  %638 = vmatpush3.bf16.xpose.msk.msra.mxu0 %vm1014_vm1, %v633_v17  ;;  %v663_v26 = vpack.c.bf16 %v277_v25, %v276_v23  ;;  %v645_v30 = vpack.c.bf16 %v165_v28, %v164_v27  ;;  %v279_v31 = vld [vmem:[#allocation12 + $0x28] sm:$0xff]  ;;  %v166_v33 = vld [vmem:[#allocation10 + $0x30] sm:$0xff]  ;;  %v167_v34 = vld [vmem:[#allocation10 + $0x38] sm:$0xff] }
  0x74   :  { %113 = vadd.xlane.f32.xlu0 %v112_v3  ;;  %662 = vmatpush3.bf16.xpose.msk.msra.mxu1 %vm1014_vm1, %v657_v20  ;;  %v669_v32 = vpack.c.bf16 %v279_v31, %v278_v29  ;;  %v280_v35 = vld [vmem:[#allocation12 + $0x30] sm:$0xff]  ;;  %v651_v36 = vpack.c.bf16 %v167_v34, %v166_v33  ;;  %v281_v37 = vld [vmem:[#allocation12 + $0x38] sm:$0xff]  ;;  %v399_v57 = vld [vmem:[#allocation13] sm:$0xff]  ;;  %p854_p9 = por %p853_p8, %p852_p7 }
  0x75   :  { %641 = vmatprep.subr.msk.bf16.mxu0 %vm1014_vm1, %v639_v24  ;;  %665 = vmatprep.subr.msk.bf16.mxu1 %vm1014_vm1, %v663_v26  ;;  %v675_v38 = vpack.c.bf16 %v281_v37, %v280_v35  ;;  %v528_v46 = vld [vmem:[#allocation7] ss:$0 sm:$0xff]  ;;  %v529_v48 = vld [vmem:[#allocation9] ss:$0 sm:$0xff]  ;;  %v400_v58 = vld [vmem:[#allocation13 + $0x8] sm:$0xff] }
  0x76   :  { %v681_v59 = vpack.c.bf16 %v400_v58, %v399_v57  ;;  %vm682_vm3 = vmpackc.low %vm403_vm2, %vm403_vm2  ;;  %v401_v60 = vld [vmem:[#allocation13 + $0x10] sm:$0xff]  ;;  %v402_v61 = vld [vmem:[#allocation13 + $0x18] sm:$0xff]  ;;  %p855_p10 = pnand %p854_p9, %p848_p6 }
  0x77   :  { %v687_v62 = vpack.c.bf16 %v402_v61, %v401_v60  ;;  %v398_v16 = vld [vmem:[#allocation3 + $0x8] sm:$0xff] }
  0x78   :  { %v397_v17 = vld [vmem:[#allocation3] sm:$0xff] }
  0x7b   :  { %644 = vmatpush3.bf16.xpose.msk.msra.mxu0 %vm1014_vm1, %v639_v24 }
  0x7c   :  { %668 = vmatpush3.bf16.xpose.msk.msra.mxu1 %vm1014_vm1, %v663_v26  ;;  %647 = vmatprep.subr.msk.bf16.mxu0 %vm1014_vm1, %v645_v30 }
  0x7d   :  { %671 = vmatprep.subr.msk.bf16.mxu1 %vm1014_vm1, %v669_v32 }
  0x83   :  { %650 = vmatpush3.bf16.xpose.msk.msra.mxu0 %vm1014_vm1, %v645_v30 }
  0x84   :  { %674 = vmatpush3.bf16.xpose.msk.msra.mxu1 %vm1014_vm1, %v669_v32  ;;  %653 = vmatprep.subr.msk.bf16.mxu0 %vm1014_vm1, %v651_v36 }
  0x85   :  { %677 = vmatprep.subr.msk.bf16.mxu1 %vm1014_vm1, %v675_v38 }
  0x8b   :  { %656 = vmatpush3.bf16.xpose.msk.msra.mxu0 %vm1014_vm1, %v651_v36 }
  0x8c   :  { %680 = vmatpush3.bf16.xpose.msk.msra.mxu1 %vm1014_vm1, %v675_v38  ;;  %683 = vmatprep.subr.msk.bf16.mxu0 %vm682_vm3, %v681_v59 }
  0xfd   :  { %v111_v4 = vpop.xlane.xlu0 %110 }
  0xfe   :  { %v116_v5 = vmul.f32 0.03125, %v111_v4 }
 0x100   :  { %v118_v6 = vsub.f32 %v106_v0, %v116_v5 }
 0x101   :  { %v114_v7 = vpop.xlane.xlu0 %113 }
 0x102   :  { %v117_v8 = vmul.f32 0.03125, %v114_v7  ;;  %v120_v9 = vmul.f32 %v118_v6, %v118_v6 }
 0x104   :  { %v119_v10 = vsub.f32 %v107_v1, %v117_v8  ;;  %v122_v11 = vsel %vm108_vm0, %v120_v9, 0.0 }
 0x105   :  { %123 = vadd.xlane.f32.xlu1 %v122_v11 }
 0x106   :  { %v121_v12 = vmul.f32 %v119_v10, %v119_v10 }
 0x108   :  { %v125_v13 = vsel %vm108_vm0, %v121_v12, 0.0 }
 0x109   :  { %126 = vadd.xlane.f32.xlu1 %v125_v13 }
 0x192   :  { %v124_v39 = vpop.xlane.xlu1 %123 }
 0x193   :  { %v128_v40 = vmul.f32 0.03125, %v124_v39 }
 0x195   :  { %v130_v41 = vadd.f32 1e-05, %v128_v40 }
 0x196   :  { %v127_v42 = vpop.xlane.xlu1 %126 }
 0x197   :  { %703 = vrsqrt.f32 %v130_v41  ;;  %v129_v43 = vmul.f32 0.03125, %v127_v42 }
 0x199   :  { %v131_v44 = vadd.f32 1e-05, %v129_v43 }
 0x19b   :  { %705 = vrsqrt.f32 %v131_v44 }
 0x1a1   :  { %v704_v45 = vpop.eup %703 }
 0x1a2   :  { %v134_v47 = vmul.f32 %v704_v45, %v118_v6 }
 0x1a4   :  { %v143_v49 = vmul.f32 %v528_v46, %v134_v47 }
 0x1a5   :  { %v706_v50 = vpop.eup %705 }
 0x1a6   :  { %v152_v51 = vadd.f32 %v529_v48, %v143_v49  ;;  %v135_v52 = vmul.f32 %v706_v50, %v119_v10 }
 0x1a8   :  { %154 = vst.msk [vmem:[#allocation2] sm:$0xff] %vm108_vm0, %v152_v51  ;;  %v144_v53 = vmul.f32 %v528_v46, %v135_v52 }
 0x1aa   :  { %v153_v54 = vadd.f32 %v529_v48, %v144_v53 }
 0x1ac   :  { %155 = vst.msk [vmem:[#allocation2 + $0x8] sm:$0xff] %vm108_vm0, %v153_v54 }
 0x1af   :  { %v158_v55 = vld [vmem:[#allocation2] sm:$0xff] }
 0x1b0   :  { %600 = vmatprep.mubr.msk.f32.mxu0 %vm108_vm0, %v158_v55  ;;  %619 = vmatprep.mubr.msk.f32.mxu1 %vm108_vm0, %v158_v55 }
 0x1b3   :  { %v159_v56 = vld [vmem:[#allocation2 + $0x8] sm:$0xff] }
 0x1b4   :  { %601 = vmatmul.mubr.msk.f32.vlgmr.msra.gmra.mrb[0].mxu0 %vm108_vm0, %v159_v56  ;;  %620 = vmatmul.mubr.msk.f32.vlgmr.msra.gmra.mrb[0].mxu1 %vm108_vm0, %v159_v56 }
 0x1b5   :  { %686 = vmatpush3.bf16.xpose.msk.msra.mxu0 %vm682_vm3, %v681_v59 }
 0x1b6   :  { %689 = vmatprep.subr.msk.bf16.mxu0 %vm682_vm3, %v687_v62 }
 0x1bd   :  { %692 = vmatpush3.bf16.xpose.msk.msra.mxu0 %vm682_vm3, %v687_v62 }
 0x287   :  { %v602_v0 = vpop.f32.mrb[0].mxu0  ;;  %v621_v1 = vpop.f32.mrb[0].mxu1 }
 0x288   :  { %v551_v2 = vmul.f32 -1.442695, %v621_v1  ;;  %v265_v3 = vpop.f32.mrb[1].mxu0  ;;  %v372_v4 = vpop.f32.mrb[1].mxu1 }
 0x289   :  { %v550_v5 = vmul.f32 -1.442695, %v372_v4 }
 0x28a   :  { %707 = vpow2.f32 %v551_v2 }
 0x28b   :  { %709 = vpow2.f32 %v550_v5 }
 0x294   :  { %v708_v6 = vpop.eup %707 }
 0x295   :  { %v710_v7 = vpop.eup %709  ;;  %v388_v8 = vadd.f32 1.0, %v708_v6 }
 0x296   :  { %v387_v9 = vadd.f32 1.0, %v710_v7 }
 0x297   :  { %711 = vrcp.f32 %v388_v8 }
 0x298   :  { %713 = vrcp.f32 %v387_v9 }
 0x2a1   :  { %v712_v10 = vpop.eup %711 }
 0x2a2   :  { %v714_v11 = vpop.eup %713  ;;  %v394_v12 = vmul.f32 %v712_v10, %v621_v1 }
 0x2a3   :  { %v393_v13 = vmul.f32 %v714_v11, %v372_v4 }
 0x2a4   :  { %v396_v14 = vmul.f32 %v602_v0, %v394_v12 }
 0x2a5   :  { %v395_v15 = vmul.f32 %v393_v13, %v265_v3 }
 0x2a7   :  { %630 = vmatprep.mubr.msk.f32.mxu0 %vm403_vm2, %v395_v15 }
 0x2a8   :  { %631 = vmatmul.mubr.msk.f32.vlgmr.msra.gmra.mrb[2].mxu0 %vm403_vm2, %v396_v14 }
 0x37b   :  { %v632_v18 = vpop.f32.mrb[2].mxu0 }
 0x37c   :  { %v498_v19 = vadd.f32 %v632_v18, %v398_v16  ;;  %v488_v20 = vpop.f32.mrb[3].mxu0 }
 0x37d   :  { %v497_v21 = vadd.f32 %v488_v20, %v397_v17 }
 0x37e   :  { %500 = vst.msk [vmem:[#allocation3 + $0x8] sm:$0xff] %vm108_vm0, %v498_v19 }
 0x37f   :  { %499 = vst.msk [vmem:[#allocation3] sm:$0xff] %vm108_vm0, %v497_v21 }
 0x385   :  { %v505_v22 = vld [vmem:[#allocation3 + $0x8] sm:$0xff] }
 0x386   :  { %v504_v23 = vld [vmem:[#allocation3] sm:$0xff]  ;;  %507 = vst.msk [vmem:[#allocation15 + $0x8] sm:$0xff] %vm108_vm0, %v505_v22 }
 0x387   :  { %506 = vst.msk [vmem:[#allocation15] sm:$0xff] %vm108_vm0, %v504_v23 }
 0x388   :  { %858 = shalt.err (!%p855_p10)
}
 0x389   :  { %s859_s24 = scalar_lea.hbm %s1087_s6, 256 }
 0x38a   :  { %p860_p11 = scmp.ne.s32.totalorder %s1087_s6, %s859_s24  ;;  %p863_p12 = scmp.lt.u32.totalorder %s859_s24, %s1087_s6 }
 0x38c   :  { %p865_p13 = pnand %p863_p12, %p860_p11 }
 0x38e   :  { %868 = shalt.err (!%p865_p13)
}
 0x38f   :  { %519 = dma.vmem_to_hbm [thread:$0]  %s514_s1, 256, %s1087_s6, [#allocation6], %s882_s21, %s882_s21, %s883_s22  }
 0x390   :  { %877 = dma.done.wait [#allocation6], 256  }
 0x391   :  { %878 = vsyncadd [#allocation6], 4294967040 }
 0x392   :  { %523 = vsyncpa [#allocation5], 1 }
 0x393   :  { %524 = vsyncpa [#allocation8], 1 }
 0x394   :  { %525 = vsyncpa [#allocation11], 1 }
 0x395   :  { %526 = vsyncpa [#allocation14], 1 }
 0x396   :  { %527 = vsyncpa [#allocation6], 1 }

</bundles_post_ra>
